<compile_context>
chip_gen: v7x
topology: tpu7x:2x2x1
jax: 0.10.0
libtpu: 0.0.40
codegen_flags: <defaults>
</compile_context>

<pallas_src>
import jax
import jax.numpy as jnp
from jax.experimental import pallas as pl
from jax.experimental.pallas import tpu as pltpu

EPS = 1e-5  # nn.InstanceNorm1d default


def _add_instnorm_kernel(x1_ref, x2_ref, gamma_ref, beta_ref, out_ref):
    # x1/x2/out: (TILE_B, P, TILE_E) in VMEM; gamma/beta: (1, TILE_E).
    # fp32 upcast BEFORE the add so low-precision inputs keep mantissa bits
    # in the statistics.
    x = x1_ref[...].astype(jnp.float32) + x2_ref[...].astype(jnp.float32)
    mean = jnp.mean(x, axis=1, keepdims=True)                   # (TB, 1, TE)
    centered = x - mean
    var = jnp.mean(centered * centered, axis=1, keepdims=True)  # biased var
    inv_std = jax.lax.rsqrt(var + EPS)                          # EUP slot
    gamma = gamma_ref[...].astype(jnp.float32)[:, None, :]      # (1, 1, TE)
    beta = beta_ref[...].astype(jnp.float32)[:, None, :]
    # Fold normalization + affine into one scale/shift elementwise pass;
    # `centered` is dead after the var reduction (fewer live fp32 temps).
    scale = inv_std * gamma                                     # (TB, 1, TE)
    shift = beta - mean * scale                                 # (TB, 1, TE)
    out_ref[...] = (x * scale + shift).astype(out_ref.dtype)


def _choose_tiles(B, P, E, itemsize, budget_bytes=12 << 20):
    """Pick (tile_b, tile_e).

    Budget counts the 6 double-buffered pipeline buffers (2 in + 1 out, in the
    input dtype) PLUS ~2 full-tile fp32 in-kernel temporaries.
    tile_e is lane-dense (multiple of 128) whenever E allows it; tile_b folds
    batches but keeps >= 2 grid steps along batch when B >= 2 (v7x megacore).
    """
    per_elem = 6 * itemsize + 8  # pipeline buffers + fp32 temporaries

    # --- channel tile ---
    if E % 128 != 0:
        # TODO(synk): for E not a multiple of 128, pack k=128//E rows per vreg
        # instead of accepting masked lanes.
        tile_e = E
    else:
        tile_e = E
        while P * tile_e * per_elem > budget_bytes and tile_e > 128:
            cand = tile_e - 128
            while cand >= 128 and (E % cand != 0):
                cand -= 128
            if cand < 128:
                break
            tile_e = cand

    # --- batch tile ---
    min_batch_steps = 2 if B >= 2 else 1
    tile_b = 1
    for cand in range(B, 0, -1):
        if B % cand != 0:
            continue
        if (B // cand) < min_batch_steps:
            continue
        if cand * P * tile_e * per_elem <= budget_bytes:
            tile_b = cand
            break
    return tile_b, tile_e


def add_and_instance_norm(input1, input2, gamma, beta):
    """Pallas equivalent of AddAndInstanceNormalization.forward."""
    B, P, E = input1.shape
    itemsize = input1.dtype.itemsize
    tile_b, tile_e = _choose_tiles(B, P, E, itemsize)
    grid = (B // tile_b, pl.cdiv(E, tile_e))

    # TODO(synk): for very large P the full-P block would not fit VMEM; a
    # two-pass sum/sum-sq accumulation over an extra "arbitrary" P grid axis
    # would be needed (not required at LRP problem sizes).

    gamma2 = gamma.reshape(1, E)
    beta2 = beta.reshape(1, E)

    cost = pl.CostEstimate(
        flops=8 * B * P * E,
        transcendentals=B * E,  # one rsqrt per (batch, channel)
        bytes_accessed=3 * B * P * E * itemsize + 2 * E * 4,
    )

    out = pl.pallas_call(
        _add_instnorm_kernel,
        out_shape=jax.ShapeDtypeStruct((B, P, E), input1.dtype),
        grid_spec=pltpu.PrefetchScalarGridSpec(
            num_scalar_prefetch=0,
            grid=grid,
            in_specs=[
                pl.BlockSpec((tile_b, P, tile_e), lambda b, j: (b, 0, j)),
                pl.BlockSpec((tile_b, P, tile_e), lambda b, j: (b, 0, j)),
                # Constant along the batch axis -> no re-DMA of the small
                # affine vectors per batch step.
                pl.BlockSpec((1, tile_e), lambda b, j: (0, j)),
                pl.BlockSpec((1, tile_e), lambda b, j: (0, j)),
            ],
            out_specs=pl.BlockSpec((tile_b, P, tile_e), lambda b, j: (b, 0, j)),
        ),
        compiler_params=pltpu.CompilerParams(
            dimension_semantics=("parallel", "parallel"),
            vmem_limit_bytes=32 << 20,
        ),
        cost_estimate=cost,
    )(input1, input2, gamma2, beta2)
    return out


def _reference(input1, input2, gamma, beta):
    # Pure-JAX reference mirroring the PyTorch module (InstanceNorm1d over P).
    x = input1.astype(jnp.float32) + input2.astype(jnp.float32)   # (B, P, E)
    mean = jnp.mean(x, axis=1, keepdims=True)
    var = jnp.mean((x - mean) ** 2, axis=1, keepdims=True)
    y = (x - mean) / jnp.sqrt(var + EPS)
    y = y * gamma.reshape(1, 1, -1) + beta.reshape(1, 1, -1)
    return y.astype(input1.dtype)


if __name__ == "__main__":
    # Small shapes consistent with the module:
    # batch=4, problem nodes=24 (1 depot + 3 DPs + 20 customers), embedding_dim=128.
    B, P, E = 4, 24, 128
    key = jax.random.PRNGKey(0)
    k1, k2 = jax.random.split(key)
    input1 = jax.random.normal(k1, (B, P, E), dtype=jnp.float32)
    input2 = jax.random.normal(k2, (B, P, E), dtype=jnp.float32)

    # InstanceNorm1d(affine=True) default init is weight=1, bias=0; perturb
    # slightly so the affine path is exercised.
    gamma = 1.0 + 0.01 * jnp.arange(E, dtype=jnp.float32)
    beta = 0.01 * jnp.arange(E, dtype=jnp.float32)

    out = add_and_instance_norm(input1, input2, gamma, beta)
    out = jax.block_until_ready(out)

    ref = _reference(input1, input2, gamma, beta)
    assert out.shape == (B, P, E)
    assert jnp.allclose(out, ref, atol=1e-4, rtol=1e-4)
    print("KERNEL_OK")
</pallas_src>

<mosaic_0001>
module attributes {stable_mosaic.version = 11 : i64} {
  func.func @_add_instnorm_kernel(%arg0: i32, %arg1: i32, %arg2: memref<2x24x128xf32, #tpu.memory_space<vmem>>, %arg3: memref<2x24x128xf32, #tpu.memory_space<vmem>>, %arg4: memref<1x128xf32, #tpu.memory_space<vmem>>, %arg5: memref<1x128xf32, #tpu.memory_space<vmem>>, %arg6: memref<2x24x128xf32, #tpu.memory_space<vmem>>) attributes {dimension_semantics = [#tpu.dimension_semantics<parallel>, #tpu.dimension_semantics<parallel>], iteration_bounds = array<i64: 2, 1>, scalar_prefetch = 0 : i64, scratch_operands = 0 : i64, tpu.core_type = #tpu.core_type<tc>, window_params = [{transform_indices = @transform_0, window_bounds = array<i64: 2, 24, 128>}, {transform_indices = @transform_1, window_bounds = array<i64: 2, 24, 128>}, {transform_indices = @transform_2, window_bounds = array<i64: 1, 128>}, {transform_indices = @transform_3, window_bounds = array<i64: 1, 128>}, {transform_indices = @transform_4, window_bounds = array<i64: 2, 24, 128>}]} {
    %c0 = arith.constant 0 : index
    %c0_0 = arith.constant 0 : index
    %c0_1 = arith.constant 0 : index
    %0 = vector.load %arg2[%c0, %c0_0, %c0_1] : memref<2x24x128xf32, #tpu.memory_space<vmem>>, vector<2x24x128xf32>
    %c0_2 = arith.constant 0 : index
    %c0_3 = arith.constant 0 : index
    %c0_4 = arith.constant 0 : index
    %1 = vector.load %arg3[%c0_2, %c0_3, %c0_4] : memref<2x24x128xf32, #tpu.memory_space<vmem>>, vector<2x24x128xf32>
    %2 = arith.addf %0, %1 : vector<2x24x128xf32>
    %cst = arith.constant dense<0.000000e+00> : vector<2x128xf32>
    %3 = vector.multi_reduction <add>, %2, %cst [1] : vector<2x24x128xf32> to vector<2x128xf32>
    %4 = vector.shape_cast %3 : vector<2x128xf32> to vector<2x1x128xf32>
    %cst_5 = arith.constant 2.400000e+01 : f32
    %5 = vector.broadcast %cst_5 : f32 to vector<2x1x128xf32>
    %6 = arith.divf %4, %5 : vector<2x1x128xf32>
    %7 = vector.broadcast %6 : vector<2x1x128xf32> to vector<2x24x128xf32>
    %8 = arith.subf %2, %7 : vector<2x24x128xf32>
    %9 = arith.mulf %8, %8 : vector<2x24x128xf32>
    %cst_6 = arith.constant dense<0.000000e+00> : vector<2x128xf32>
    %10 = vector.multi_reduction <add>, %9, %cst_6 [1] : vector<2x24x128xf32> to vector<2x128xf32>
    %11 = vector.shape_cast %10 : vector<2x128xf32> to vector<2x1x128xf32>
    %cst_7 = arith.constant 2.400000e+01 : f32
    %12 = vector.broadcast %cst_7 : f32 to vector<2x1x128xf32>
    %13 = arith.divf %11, %12 : vector<2x1x128xf32>
    %cst_8 = arith.constant 9.99999974E-6 : f32
    %14 = vector.broadcast %cst_8 : f32 to vector<2x1x128xf32>
    %15 = arith.addf %13, %14 : vector<2x1x128xf32>
    %16 = math.rsqrt %15 : vector<2x1x128xf32>
    %c0_9 = arith.constant 0 : index
    %c0_10 = arith.constant 0 : index
    %17 = vector.load %arg4[%c0_9, %c0_10] : memref<1x128xf32, #tpu.memory_space<vmem>>, vector<1x128xf32>
    %18 = vector.shape_cast %17 : vector<1x128xf32> to vector<1x1x128xf32>
    %c0_11 = arith.constant 0 : index
    %c0_12 = arith.constant 0 : index
    %19 = vector.load %arg5[%c0_11, %c0_12] : memref<1x128xf32, #tpu.memory_space<vmem>>, vector<1x128xf32>
    %20 = vector.shape_cast %19 : vector<1x128xf32> to vector<1x1x128xf32>
    %21 = vector.broadcast %18 : vector<1x1x128xf32> to vector<2x1x128xf32>
    %22 = arith.mulf %16, %21 : vector<2x1x128xf32>
    %23 = arith.mulf %6, %22 : vector<2x1x128xf32>
    %24 = vector.broadcast %20 : vector<1x1x128xf32> to vector<2x1x128xf32>
    %25 = arith.subf %24, %23 : vector<2x1x128xf32>
    %26 = vector.broadcast %22 : vector<2x1x128xf32> to vector<2x24x128xf32>
    %27 = arith.mulf %2, %26 : vector<2x24x128xf32>
    %28 = vector.broadcast %25 : vector<2x1x128xf32> to vector<2x24x128xf32>
    %29 = arith.addf %27, %28 : vector<2x24x128xf32>
    %c0_13 = arith.constant 0 : index
    %c0_14 = arith.constant 0 : index
    %c0_15 = arith.constant 0 : index
    %30 = vector.load %arg6[%c0_13, %c0_14, %c0_15] : memref<2x24x128xf32, #tpu.memory_space<vmem>>, vector<2x24x128xf32>
    tpu.vector_store %arg6[%c0_13, %c0_14, %c0_15], %29 {strides = array<i32>} : memref<2x24x128xf32, #tpu.memory_space<vmem>>, vector<2x24x128xf32>,
    return
  }
  func.func @transform_0(%arg0: i32, %arg1: i32) -> (i32, i32, i32) {
    %c0_i32 = arith.constant 0 : i32
    %c0_i32_0 = arith.constant 0 : i32
    return %arg0, %c0_i32, %arg1 : i32, i32, i32
  }
  func.func @transform_1(%arg0: i32, %arg1: i32) -> (i32, i32, i32) {
    %c0_i32 = arith.constant 0 : i32
    %c0_i32_0 = arith.constant 0 : i32
    return %arg0, %c0_i32, %arg1 : i32, i32, i32
  }
  func.func @transform_2(%arg0: i32, %arg1: i32) -> (i32, i32) {
    %c0_i32 = arith.constant 0 : i32
    %c0_i32_0 = arith.constant 0 : i32
    return %c0_i32, %arg1 : i32, i32
  }
  func.func @transform_3(%arg0: i32, %arg1: i32) -> (i32, i32) {
    %c0_i32 = arith.constant 0 : i32
    %c0_i32_0 = arith.constant 0 : i32
    return %c0_i32, %arg1 : i32, i32
  }
  func.func @transform_4(%arg0: i32, %arg1: i32) -> (i32, i32, i32) {
    %c0_i32 = arith.constant 0 : i32
    %c0_i32_0 = arith.constant 0 : i32
    return %arg0, %c0_i32, %arg1 : i32, i32, i32
  }
}

</mosaic_0001>

<bundles_post_ra>
// kernel: tpu_custom_call.1
= control target key start
LH: loop header
LB: loop body
LE: loop exit
PB: predicated region body
PF: predicated region fallthrough
CT: control target
= control target key end

     0   :  { %9 = vsyncpa [#allocation3], 0  ;;  %s1132_s0 = inlined_call_operand.hbm [shape: f32[4,24,128], index: 0, kind: input, shape index: {}]   ;;  %s1133_s1 = inlined_call_operand.hbm [shape: f32[4,24,128], index: 1, kind: input, shape index: {}]   ;;  %s1134_s2 = inlined_call_operand.vmem [shape: f32[1,128], index: 2, kind: input, shape index: {}]   ;;  %s1135_s3 = inlined_call_operand.vmem [shape: f32[1,128], index: 3, kind: input, shape index: {}]   ;;  %s1136_s4 = inlined_call_operand.hbm [shape: f32[4,24,128], index: 4, kind: output, shape index: {}]  }
   0x1   :  { %11 = vsyncpa [#allocation3 + $0x1], 0 }
   0x2   :  { %12 = vsyncpa [#allocation6], 0 }
   0x3   :  { %14 = vsyncpa [#allocation6 + $0x1], 0 }
   0x4   :  { %15 = vsyncpa [#allocation4], 0 }
   0x5   :  { %17 = vsyncpa [#allocation4 + $0x1], 0  ;;  %s855_s15 = smov 0   ;;  %s857_s16 = smov 0  }
   0x6   :  { %s859_s17 = smov 0   ;;  %s861_s18 = smov 0  }
   0x7   :  { %s863_s19 = smov 0   ;;  %s865_s20 = smov 0  }
   0x8 LB: > { %s576_s21 = sadd.s32 4294967295, %s821_s20   ;;  %s577_s22 = sadd.s32 4294967294, %s821_s20   ;;  %s821_s20 = sphi %s865_s20, %s23_s20   ;;  %s817_s19 = sphi %s863_s19, %s1156_s19   ;;  %s813_s18 = sphi %s861_s18, %s1155_s18   ;;  %s809_s17 = sphi %s859_s17, %s1154_s17   ;;  %s805_s16 = sphi %s857_s16, %s1153_s16   ;;  %s801_s15 = sphi %s855_s15, %s1152_s15  }
   0x9   : > { %s35_s23 = sadd.s32 1, %s817_s19  ;;  %s44_s24 = sadd.s32 1, %s809_s17 }
   0xa   : > { %p37_p0 = scmp.ge.s32.totalorder %s35_s23, 2  ;;  %p51_p1 = scmp.ne.s32.totalorder %s809_s17, %s805_s16 }
   0xb   : > { %p52_p2 = scmp.eq.s32.totalorder %s821_s20, 0  ;;  %p57_p3 = scmp.ne.s32.totalorder %s805_s16, %s801_s15 }
   0xc   : > { %s1158_s23 = smov (%p37_p0, %s35_s23), 0  ;;  %p58_p5 = scmp.eq.s32.totalorder %s576_s21, 0 }
   0xd   : > { %p896_p4 = por %p52_p2, %p51_p1  ;;  %s39_s26 = ssub.s32 %s817_s19, %s1158_s23 }
   0xe   : > { %p163_p6 = scmp.eq.s32.totalorder %s576_s21, 1  ;;  %p42_p7 = scmp.eq.s32.totalorder %s39_s26, 0 }
   0xf   : > { %p902_p8 = por %p58_p5, %p57_p3  ;;  %p169_p10 = scmp.eq.s32.totalorder %s577_s22, 1 }
  0x10   : > { %p906_p9 = por %p163_p6, %p51_p1  ;;  %p617_p13 = scmp.lt.s32.totalorder %s821_s20, 2 }
  0x11   : > { %s1141_s27 = scalar_select %p902_p8, 1, 0 }
  0x12   : > { %s1142_s28 = scalar_select %p906_p9, 1, 0 }
  0x13   : > { %s911_s29 = scalar_select %p42_p7, %s809_s17, %s44_s24  }
  0x14   : > { %p913_p11 = por %p169_p10, %p57_p3  ;;  %s920_s5 = sand.u32 1, %s809_s17  }
  0x15   : > { %s594_s6 = smul.u32 48, %s920_s5  ;;  %p926_p0 = pnand %p617_p13, %p896_p4 }
  0x16   : > { %s1143_s30 = scalar_select %p913_p11, 1, 0 }
  0x17   : > { %s595_s7 = smul.u32 768, %s817_s19  ;;  %s205_s12 = scalar_lea.vmem [#allocation2], %s594_s6 }
  0x18   : > { %s214_s13 = sshll.u32 %s205_s12, 4  ;;  %s202_s14 = scalar_lea.sflag [#allocation3], %s920_s5  ;;  %s939_s13 = int_to_ptr.vmem [resolvable:$true] %s214_s13 }
  0x19   : > { %s935_s11 = scalar_lea.hbm %s1132_s0, %s595_s7  ;;  %p677_p3 = pneg %p926_p0 }
  0x1a   : > { %s675_s21 = scalar_lea.hbm %s935_s11, 768  ;;  %s680_s25 = scalar_lea.hbm %s1132_s0, 1536 }
  0x1b   : > { %p676_p2 = scmp.ne.s32.totalorder %s935_s11, %s675_s21  ;;  %p681_p6 = scmp.lt.u32.totalorder %s935_s11, %s1132_s0 }
  0x1c   : > { %p682_p7 = scmp.lt.u32.totalorder %s680_s25, %s675_s21  ;;  %p684_p13 = scmp.lt.u32.totalorder %s675_s21, %s935_s11 }
  0x1d   : > { %p678_p4 = pnand %p677_p3, %p676_p2 }
  0x1e   : > { %p683_p10 = por %p682_p7, %p681_p6 }
  0x1f   : > { %p679_p5 = pneg %p678_p4 }
  0x20   : > { %p685_p12 = por %p684_p13, %p683_p10 }
  0x22   : > { %p686_p1 = pnand %p685_p12, %p679_p5 }
  0x24   : > { %689 = shalt.err (!%p686_p1)
}
  0x25   : > { %s690_s10 = scalar_lea.vmem %s939_s13, 768  ;;  %s823_s12 = smov [#allocation2]  }
  0x26   : > { %p691_p2 = scmp.ne.s32.totalorder %s939_s13, %s690_s10  ;;  %s695_s22 = sshll.u32 %s823_s12, 4  ;;  %s696_s22 = int_to_ptr.vmem [resolvable:$false] %s695_s22 }
  0x27   : > { %s697_s24 = scalar_lea.vmem %s696_s22, 1536  ;;  %p698_p9 = scmp.lt.s32.totalorder %s939_s13, %s696_s22 }
  0x28   : > { %p693_p4 = pnand %p691_p2, %p677_p3  ;;  %p699_p6 = scmp.lt.s32.totalorder %s697_s24, %s690_s10 }
  0x2a   : > { %p694_p11 = pneg %p693_p4  ;;  %p700_p7 = por %p699_p6, %p698_p9 }
  0x2c   : > { %p701_p10 = pnand %p700_p7, %p694_p11 }
  0x2e   : > { %704 = shalt.err (!%p701_p10)
}
  0x2f   : > { %s1138_s21 = smov 128   ;;  %s825_s25 = smov 8  }
  0x30   : > { %609 = dma.hbm_to_vmem [thread:$0]  (!%p926_p0), %s935_s11, 768, %s939_s13, %s202_s14, %s1138_s21, %s1138_s21, %s825_s25  }
  0x31   : > { %p245_p9 = scmp.lt.s32.totalorder %s821_s20, 3  ;;  %s979_s10 = scalar_lea.hbm %s1133_s1, %s595_s7 }
  0x32   : > { %p1145_p11 = scmp.ge.s32.totalorder %s821_s20, 1  ;;  %s228_s22 = scalar_lea.vmem [#allocation5], %s594_s6 }
  0x33   : > { %s237_s24 = sshll.u32 %s228_s22, 4  ;;  %s225_s11 = scalar_lea.sflag [#allocation6], %s920_s5  ;;  %s989_s24 = int_to_ptr.vmem [resolvable:$true] %s237_s24 }
  0x34   : > { %p983_p12 = pnand %p1145_p11, %p245_p9  ;;  %s705_s13 = scalar_lea.hbm %s979_s10, 768 }
  0x35   : > { %p706_p1 = scmp.ne.s32.totalorder %s979_s10, %s705_s13  ;;  %s710_s26 = scalar_lea.hbm %s1133_s1, 1536 }
  0x36   : > { %p711_p2 = scmp.lt.u32.totalorder %s979_s10, %s1133_s1  ;;  %p712_p4 = scmp.lt.u32.totalorder %s710_s26, %s705_s13 }
  0x37   : > { %p708_p5 = pnand %p706_p1, %p677_p3  ;;  %p714_p7 = scmp.lt.u32.totalorder %s705_s13, %s979_s10 }
  0x38   : > { %p713_p6 = por %p712_p4, %p711_p2 }
  0x39   : > { %p709_p13 = pneg %p708_p5 }
  0x3a   : > { %p715_p10 = por %p714_p7, %p713_p6 }
  0x3c   : > { %p716_p9 = pnand %p715_p10, %p709_p13 }
  0x3e   : > { %719 = shalt.err (!%p716_p9)
}
  0x3f   : > { %s720_s6 = scalar_lea.vmem %s989_s24, 768  ;;  %s826_s22 = smov [#allocation5]  }
  0x40   : > { %p721_p11 = scmp.ne.s32.totalorder %s989_s24, %s720_s6  ;;  %s725_s7 = sshll.u32 %s826_s22, 4  ;;  %s726_s7 = int_to_ptr.vmem [resolvable:$false] %s725_s7 }
  0x41   : > { %s727_s21 = scalar_lea.vmem %s726_s7, 1536  ;;  %p728_p8 = scmp.lt.s32.totalorder %s989_s24, %s726_s7 }
  0x42   : > { %p723_p1 = pnand %p721_p11, %p677_p3  ;;  %p729_p2 = scmp.lt.s32.totalorder %s727_s21, %s720_s6 }
  0x44   : > { %p724_p5 = pneg %p723_p1  ;;  %p730_p4 = por %p729_p2, %p728_p8 }
  0x46   : > { %p731_p6 = pnand %p730_p4, %p724_p5 }
  0x48   : > { %734 = shalt.err (!%p731_p6)
}
  0x49   : > { %s1147_s13 = smov 128   ;;  %249 = sbr.rel (%p983_p12) target bundleno = 169 (0xa9), region = 36 }
  0x4a   : > { %612 = dma.hbm_to_vmem [thread:$0]  (!%p926_p0), %s979_s10, 768, %s989_s24, %s225_s11, %s1147_s13, %s1147_s13, %s825_s25  }
  0x4b   : > { %s1023_s14 = sand.u32 (!%p983_p12), 1, %s805_s16   ;;  %p1148_p8 = scmp.ne.s32.totalorder (!%p983_p12), %s1141_s27, 0 }
  0x4c   : > { %s1026_s26 = smul.u32 (!%p983_p12), 48, %s1023_s14  ;;  %s252_s8 = scalar_lea.sflag (!%p983_p12), [#allocation3], %s1023_s14 }
  0x4e   : > { %s255_s9 = scalar_lea.vmem (!%p983_p12), [#allocation2], %s1026_s26 }
  0x50   : > { %788 = dma.done.wait (%p1148_p8), %s252_s8, 768  }
  0x51   : > { %790 = vsyncadd (%p1148_p8), %s252_s8, 4294966528  ;;  %s261_s5 = scalar_lea.sflag [#allocation6], %s1023_s14  ;;  %s264_s25 = scalar_lea.vmem [#allocation5], %s1026_s26 }
  0x52   : > { %792 = dma.done.wait (%p1148_p8), %s261_s5, 768  }
  0x53   : > { %794 = vsyncadd (%p1148_p8), %s261_s5, 4294966528  ;;  %v309_v0 = vld [vmem:[%s255_s9] sm:$0xff]  ;;  %v310_v1 = vld [vmem:[%s255_s9 + $0x8] sm:$0xff]  ;;  %s299_s11 = scalar_lea.vmem [#allocation7], %s1026_s26  ;;  %s599_s22 = smul.u32 768, %s813_s18 }
  0x54   : > { %v311_v2 = vld [vmem:[%s255_s9 + $0x10] sm:$0xff]  ;;  %v315_v3 = vld [vmem:[%s264_s25] sm:$0xff]  ;;  %v316_v4 = vld [vmem:[%s264_s25 + $0x8] sm:$0xff]  ;;  %s442_s6 = sshll.u32 %s299_s11, 4  ;;  %s427_s13 = scalar_lea.sflag [#allocation4], %s1023_s14  ;;  %s1078_s6 = int_to_ptr.vmem [resolvable:$true] %s442_s6 }
  0x55   : > { %v317_v5 = vld [vmem:[%s264_s25 + $0x10] sm:$0xff]  ;;  %v1040_v6 = vadd.f32 %v315_v3, %v309_v0  ;;  %v1042_v7 = vadd.f32 %v316_v4, %v310_v1  ;;  %v312_v9 = vld [vmem:[%s255_s9 + $0x18] sm:$0xff]  ;;  %v313_v10 = vld [vmem:[%s255_s9 + $0x20] sm:$0xff]  ;;  %v388_v3 = vlaneseq  ;;  %s1083_s18 = scalar_lea.hbm %s1136_s4, %s599_s22  ;;  %s735_s26 = scalar_lea.vmem %s1078_s6, 768 }
  0x56   : > { %v1044_v8 = vadd.f32 %v317_v5, %v311_v2  ;;  %v314_v11 = vld [vmem:[%s255_s9 + $0x28] sm:$0xff]  ;;  %v318_v12 = vld [vmem:[%s264_s25 + $0x18] sm:$0xff]  ;;  %v319_v14 = vld [vmem:[%s264_s25 + $0x20] sm:$0xff]  ;;  %p736_p0 = scmp.ne.s32.totalorder %s1078_s6, %s735_s26  ;;  %p1149_p3 = scmp.ne.s32.totalorder %s1142_s28, 0 }
  0x57   : > { %v327_v13 = vadd.f32 %v1042_v7, %v1040_v6  ;;  %v320_v15 = vld [vmem:[%s264_s25 + $0x28] sm:$0xff]  ;;  %v1048_v16 = vadd.f32 %v318_v12, %v312_v9  ;;  %v1050_v17 = vadd.f32 %v319_v14, %v313_v10  ;;  %v389_v5 = vshrl.u32 %v388_v3, 7  ;;  %v380_v9 = vld [vmem:[%s1134_s2] sm:$0x1]  ;;  %s827_s8 = smov [#allocation7]  }
  0x58   : > { %v1052_v18 = vadd.f32 %v320_v15, %v314_v11  ;;  %p737_p12 = pnand %p736_p0, %p1149_p3  ;;  %s739_s9 = sshll.u32 %s827_s8, 4  ;;  %s740_s9 = int_to_ptr.vmem [resolvable:$false] %s739_s9 }
  0x59   : > { %v328_v19 = vadd.f32 %v327_v13, %v1044_v8  ;;  %v335_v20 = vadd.f32 %v1050_v17, %v1048_v16  ;;  %v390_v10 = vsub.s32 0, %v389_v5  ;;  %v381_v13 = vld [vmem:[%s1135_s3] sm:$0x1]  ;;  %s741_s5 = scalar_lea.vmem %s740_s9, 1536  ;;  %p742_p7 = scmp.lt.s32.totalorder %s1078_s6, %s740_s9 }
  0x5a   : > { %p738_p13 = pneg %p737_p12  ;;  %p743_p10 = scmp.lt.s32.totalorder %s741_s5, %s735_s26 }
  0x5b   : > { %v329_v21 = vrot.slane %v328_v19, 4  ;;  %v336_v22 = vadd.f32 %v335_v20, %v1052_v18 }
  0x5c   : > { %p744_p9 = por %p743_p10, %p742_p7 }
  0x5d   : > { %v330_v23 = vadd.f32 %v329_v21, %v328_v19  ;;  %v337_v24 = vrot.slane %v336_v22, 4 }
  0x5e   : > { %p745_p11 = pnand %p744_p9, %p738_p13 }
  0x5f   : > { %v331_v25 = vrot.slane %v330_v23, 2  ;;  %v338_v26 = vadd.f32 %v337_v24, %v336_v22 }
  0x61   : > { %v332_v27 = vadd.f32 %v331_v25, %v330_v23  ;;  %v339_v28 = vrot.slane %v338_v26, 2 }
  0x63   : > { %v333_v29 = vrot.slane %v332_v27, 1  ;;  %v340_v30 = vadd.f32 %v339_v28, %v338_v26 }
  0x65   : > { %v334_v31 = vadd.f32 %v333_v29, %v332_v27  ;;  %v341_v32 = vrot.slane %v340_v30, 1 }
  0x67   : > { %v344_v33 = vmul.f32 0.041666668, %v334_v31  ;;  %v342_v34 = vadd.f32 %v341_v32, %v340_v30 }
  0x69   : > { %v346_v35 = vsub.f32 %v1040_v6, %v344_v33  ;;  %v347_v36 = vsub.f32 %v1042_v7, %v344_v33  ;;  %v348_v37 = vsub.f32 %v1044_v8, %v344_v33  ;;  %v345_v38 = vmul.f32 0.041666668, %v342_v34 }
  0x6b   : > { %v352_v39 = vmul.f32 %v346_v35, %v346_v35  ;;  %v353_v40 = vmul.f32 %v347_v36, %v347_v36  ;;  %v354_v41 = vmul.f32 %v348_v37, %v348_v37  ;;  %v349_v42 = vsub.f32 %v1048_v16, %v345_v38 }
  0x6c   : > { %v350_v43 = vsub.f32 %v1050_v17, %v345_v38  ;;  %v351_v44 = vsub.f32 %v1052_v18, %v345_v38 }
  0x6d   : > { %v358_v45 = vadd.f32 %v353_v40, %v352_v39  ;;  %v355_v46 = vmul.f32 %v349_v42, %v349_v42 }
  0x6e   : > { %v356_v47 = vmul.f32 %v350_v43, %v350_v43  ;;  %v357_v48 = vmul.f32 %v351_v44, %v351_v44 }
  0x6f   : > { %v359_v49 = vadd.f32 %v358_v45, %v354_v41 }
  0x70   : > { %v366_v50 = vadd.f32 %v356_v47, %v355_v46 }
  0x71   : > { %v360_v51 = vrot.slane %v359_v49, 4 }
  0x72   : > { %v367_v52 = vadd.f32 %v366_v50, %v357_v48 }
  0x73   : > { %v361_v53 = vadd.f32 %v360_v51, %v359_v49 }
  0x74   : > { %v368_v54 = vrot.slane %v367_v52, 4 }
  0x75   : > { %v362_v55 = vrot.slane %v361_v53, 2 }
  0x76   : > { %v369_v56 = vadd.f32 %v368_v54, %v367_v52 }
  0x77   : > { %v363_v57 = vadd.f32 %v362_v55, %v361_v53 }
  0x78   : > { %v370_v58 = vrot.slane %v369_v56, 2 }
  0x79   : > { %v364_v59 = vrot.slane %v363_v57, 1 }
  0x7a   : > { %v371_v60 = vadd.f32 %v370_v58, %v369_v56 }
  0x7b   : > { %v365_v61 = vadd.f32 %v364_v59, %v363_v57 }
  0x7c   : > { %v372_v62 = vrot.slane %v371_v60, 1 }
  0x7d   : > { %v374_v63 = vmul.f32 0.041666668, %v365_v61 }
  0x7e   : > { %v373_v0 = vadd.f32 %v372_v62, %v371_v60 }
  0x7f   : > { %v376_v1 = vadd.f32 1e-05, %v374_v63 }
  0x80   : > { %v375_v2 = vmul.f32 0.041666668, %v373_v0 }
  0x81   : > { %671 = vrsqrt.f32 %v376_v1 }
  0x82   : > { %v377_v4 = vadd.f32 1e-05, %v375_v2 }
  0x84   : > { %673 = vrsqrt.f32 %v377_v4 }
  0x8b   : > { %v672_v11 = vpop.eup %671 }
  0x8c   : > { %v382_v12 = vmul.f32 %v672_v11, %v380_v9 }
  0x8e   : > { %v674_v14 = vpop.eup %673  ;;  %v384_v15 = vmul.f32 %v382_v12, %v344_v33  ;;  %v391_v19 = vrot.slane %v382_v12, %v390_v10 }
  0x8f   : > { %v383_v20 = vmul.f32 %v674_v14, %v380_v9 }
  0x90   : > { %v386_v21 = vsub.f32 %v381_v13, %v384_v15  ;;  %v396_v22 = vmul.f32 %v391_v19, %v1040_v6  ;;  %v397_v23 = vmul.f32 %v391_v19, %v1042_v7  ;;  %v398_v24 = vmul.f32 %v391_v19, %v1044_v8 }
  0x91   : > { %v385_v25 = vmul.f32 %v383_v20, %v345_v38  ;;  %v395_v26 = vrot.slane %v383_v20, %v390_v10 }
  0x92   : > { %v407_v27 = vrot.slane %v386_v21, %v390_v10 }
  0x93   : > { %v387_v28 = vsub.f32 %v381_v13, %v385_v25  ;;  %v399_v29 = vmul.f32 %v395_v26, %v1048_v16  ;;  %v400_v30 = vmul.f32 %v395_v26, %v1050_v17  ;;  %v401_v31 = vmul.f32 %v395_v26, %v1052_v18 }
  0x94   : > { %v414_v32 = vadd.f32 %v407_v27, %v396_v22  ;;  %v415_v6 = vadd.f32 %v407_v27, %v397_v23  ;;  %v416_v33 = vadd.f32 %v407_v27, %v398_v24 }
  0x95   : > { %v411_v7 = vrot.slane %v387_v28, %v390_v10 }
  0x96   : > { %420 = vst [vmem:[%s299_s11] sm:$0xff] %v414_v32  ;;  %421 = vst [vmem:[%s299_s11 + $0x8] sm:$0xff] %v415_v6 }
  0x97   : > { %422 = vst [vmem:[%s299_s11 + $0x10] sm:$0xff] %v416_v33  ;;  %v417_v8 = vadd.f32 %v411_v7, %v399_v29  ;;  %v418_v16 = vadd.f32 %v411_v7, %v400_v30  ;;  %v419_v17 = vadd.f32 %v411_v7, %v401_v31 }
  0x99   : > { %423 = vst [vmem:[%s299_s11 + $0x18] sm:$0xff] %v417_v8  ;;  %424 = vst [vmem:[%s299_s11 + $0x20] sm:$0xff] %v418_v16 }
  0x9a   : > { %425 = vst [vmem:[%s299_s11 + $0x28] sm:$0xff] %v419_v17 }
  0x9b   : > { %748 = shalt.err (!%p745_p11)
}
  0x9c   : > { %s749_s25 = scalar_lea.hbm %s1083_s18, 768  ;;  %s753_s12 = scalar_lea.hbm %s1136_s4, 1536 }
  0x9d   : > { %p750_p1 = scmp.ne.s32.totalorder %s1083_s18, %s749_s25  ;;  %p754_p4 = scmp.lt.u32.totalorder %s1083_s18, %s1136_s4 }
  0x9e   : > { %p755_p6 = scmp.lt.u32.totalorder %s753_s12, %s749_s25  ;;  %p757_p0 = scmp.lt.u32.totalorder %s749_s25, %s1083_s18 }
  0x9f   : > { %p751_p5 = pnand %p750_p1, %p1149_p3 }
  0xa0   : > { %p756_p8 = por %p755_p6, %p754_p4 }
  0xa1   : > { %p752_p2 = pneg %p751_p5 }
  0xa2   : > { %p758_p12 = por %p757_p0, %p756_p8 }
  0xa4   : > { %p759_p13 = pnand %p758_p12, %p752_p2 }
  0xa6   : > { %762 = shalt.err (!%p759_p13)
}
  0xa7   : > { %s828_s22 = smov 128   ;;  %s829_s7 = smov 8  }
  0xa8   : > { %604 = dma.vmem_to_hbm [thread:$0]  (%p1149_p3), %s1078_s6, 768, %s1083_s18, %s427_s13, %s828_s22, %s828_s22, %s829_s7  }
  0xa9 PF: > { %s457_s21 = sand.u32 1, %s801_s15   ;;  %p1150_p7 = scmp.ne.s32.totalorder %s1143_s30, 0 }
  0xaa   : > { %p1151_p10 = scmp.ge.s32.totalorder %s821_s20, 2  ;;  %s458_s26 = scalar_lea.sflag [#allocation4], %s457_s21 }
  0xac   : > { %p614_p9 = pnand %p1151_p10, %p1150_p7 }
  0xae   : > { %796 = dma.done.wait (!%p614_p9), %s458_s26, 768  }
  0xaf   : > { %798 = vsyncadd (!%p614_p9), %s458_s26, 4294966528  ;;  %s23_s20 = sadd.s32 1, %s821_s20   ;;  %s1152_s15 = smov %s805_s16 }
  0xb0   : > { %p20_p11 = scmp.ge.s32.totalorder %s23_s20, 4   ;;  %s1153_s16 = smov %s809_s17 }
  0xb1   : > { %s1154_s17 = smov %s911_s29  ;;  %s1155_s18 = smov %s817_s19 }
  0xb2   : > { %s1156_s19 = smov %s1158_s23  ;;  %22 = sbr.rel (!%p20_p11) target bundleno = 8 (0x8), region = 100 }
  0xb9   :  { %463 = vsyncpa [#allocation3], 1 }
  0xba   :  { %465 = vsyncpa [#allocation3 + $0x1], 1 }
  0xbb   :  { %466 = vsyncpa [#allocation6], 1 }
  0xbc   :  { %468 = vsyncpa [#allocation6 + $0x1], 1 }
  0xbd   :  { %469 = vsyncpa [#allocation4], 1 }
  0xbe   :  { %471 = vsyncpa [#allocation4 + $0x1], 1 }

</bundles_post_ra>
